<compile_context>
chip_gen: v6e
topology: v6e:2x2x1
jax: 0.10.0
libtpu: 0.0.40
codegen_flags: <defaults>
</compile_context>

<pallas_src>
import jax
import jax.numpy as jnp
from jax.experimental import pallas as pl
from jax.experimental.pallas import tpu as pltpu

_LANES = 128           # vreg lane width
_SUBLANES = 8          # vreg sublane count (f32)
_NUM_SEGMENTS = 2      # leading "parallel" grid axis (v7x megacore split)
_MAX_TILE_ROWS = 1024  # (1024, 128) f32 = 512 KiB per input per pipeline buffer


def _make_sse_kernel(n_preds):
    """Kernel computing sum_p sum((pred_p - target)^2) over the whole grid.

    Refs: n_preds prediction tiles, 1 target tile, 1 (8,128) output partial,
    1 (tile_rows, 128) f32 accumulator scratch.
    """

    def kernel(*refs):
        pred_refs = refs[:n_preds]
        t_ref = refs[n_preds]
        o_ref = refs[n_preds + 1]
        acc_ref = refs[n_preds + 2]

        # Zero the per-segment accumulator on the first step of this segment.
        @pl.when(pl.program_id(1) == 0)
        def _init():
            acc_ref[...] = jnp.zeros_like(acc_ref)

        # Hot loop: pure VPU elementwise work, no cross-lane reductions.
        t = t_ref[...].astype(jnp.float32)
        sq = jnp.zeros_like(t)
        for p_ref in pred_refs:
            d = p_ref[...].astype(jnp.float32) - t
            sq = sq + d * d
        acc_ref[...] += sq

        # Final step of this segment: fold the (tile_rows, 128) accumulator
        # down to a single vreg-shaped (8, 128) partial and store it once.
        @pl.when(pl.program_id(1) == pl.num_programs(1) - 1)
        def _finalize():
            tile_rows = acc_ref.shape[0]
            partial = acc_ref[0:_SUBLANES, :]
            for r in range(1, tile_rows // _SUBLANES):
                partial = partial + acc_ref[r * _SUBLANES:(r + 1) * _SUBLANES, :]
            o_ref[...] = partial

    return kernel


def _sum_squared_errors(preds, target):
    """SSE over all elements: sum_p sum((preds[p] - target)^2), via Pallas."""
    for p in preds:
        assert p.shape == target.shape, (p.shape, target.shape)

    n_elems = target.size
    rows_needed = -(-n_elems // _LANES)

    # Tile rows: multiple of 8, at most _MAX_TILE_ROWS, sized so small inputs
    # don't over-pad.
    tile_rows = min(
        _MAX_TILE_ROWS,
        -(-rows_needed // (_SUBLANES * _NUM_SEGMENTS)) * _SUBLANES,
    )
    tile_rows = max(tile_rows, _SUBLANES)

    rows_per_seg = -(-rows_needed // (_NUM_SEGMENTS * tile_rows)) * tile_rows
    rows = rows_per_seg * _NUM_SEGMENTS
    tiles_per_seg = rows_per_seg // tile_rows

    def to_lane_dense(x):
        flat = jnp.ravel(x).astype(jnp.float32)
        flat = jnp.pad(flat, (0, rows * _LANES - n_elems))  # zeros -> SSE += 0
        return flat.reshape(rows, _LANES)

    args = [to_lane_dense(p) for p in preds] + [to_lane_dense(target)]
    n_in = len(args)

    in_spec = pl.BlockSpec(
        (tile_rows, _LANES), lambda c, i: (c * tiles_per_seg + i, 0)
    )
    # One (8, 128) partial per segment; stays resident across the "arbitrary"
    # axis and is only written on the last step of each segment.
    out_spec = pl.BlockSpec((_SUBLANES, _LANES), lambda c, i: (c, 0))

    # VMEM budget: n_in inputs x 2 pipeline buffers x tile + accumulator
    # scratch + output, with generous headroom (<= 32 MiB: valid on all chips).
    tile_bytes = tile_rows * _LANES * 4
    needed = n_in * 2 * tile_bytes + tile_bytes + _SUBLANES * _LANES * 4
    vmem_limit = int(min(max(4 * needed, 8 * 1024 * 1024), 32 * 1024 * 1024))

    out = pl.pallas_call(
        _make_sse_kernel(len(preds)),
        out_shape=jax.ShapeDtypeStruct(
            (_NUM_SEGMENTS * _SUBLANES, _LANES), jnp.float32
        ),
        grid_spec=pltpu.PrefetchScalarGridSpec(
            num_scalar_prefetch=0,
            grid=(_NUM_SEGMENTS, tiles_per_seg),
            in_specs=[in_spec] * n_in,
            out_specs=out_spec,
            scratch_shapes=[pltpu.VMEM((tile_rows, _LANES), jnp.float32)],
        ),
        compiler_params=pltpu.CompilerParams(
            dimension_semantics=("parallel", "arbitrary"),
            vmem_limit_bytes=vmem_limit,
        ),
    )(*args)

    # Tiny final reduction over (2*8, 128) partials in plain JAX.
    return jnp.sum(out)


def mse_loss(inputs, targets):
    """Replicates the PyTorch MSELoss module forward (reduction='mean')."""
    preds = [inputs["rgb_coarse"]]
    if "rgb_fine" in inputs:
        preds.append(inputs["rgb_fine"])
    # mean(c^2) + mean(f^2) == (SSE_c + SSE_f) / n since both share n elements.
    sse = _sum_squared_errors(preds, targets)
    return sse / jnp.float32(targets.size)


if __name__ == "__main__":
    key = jax.random.PRNGKey(0)
    k1, k2, k3 = jax.random.split(key, 3)

    n_rays, n_ch = 256, 3
    rgb_coarse = jax.random.uniform(k1, (n_rays, n_ch), dtype=jnp.float32)
    rgb_fine = jax.random.uniform(k2, (n_rays, n_ch), dtype=jnp.float32)
    targets = jax.random.uniform(k3, (n_rays, n_ch), dtype=jnp.float32)

    inputs = {"rgb_coarse": rgb_coarse, "rgb_fine": rgb_fine}
    loss = jax.block_until_ready(mse_loss(inputs, targets))

    ref = jnp.mean((rgb_coarse - targets) ** 2) + jnp.mean((rgb_fine - targets) ** 2)
    assert jnp.allclose(loss, ref, rtol=1e-5, atol=1e-6), (loss, ref)

    # Coarse-only path with a ray count that does not divide the tile size
    # (exercises zero-padding and the optional 'rgb_fine' branch).
    n2 = 100
    c2 = jax.random.uniform(k1, (n2, n_ch), dtype=jnp.float32)
    t2 = jax.random.uniform(k2, (n2, n_ch), dtype=jnp.float32)
    loss2 = jax.block_until_ready(mse_loss({"rgb_coarse": c2}, t2))
    ref2 = jnp.mean((c2 - t2) ** 2)
    assert jnp.allclose(loss2, ref2, rtol=1e-5, atol=1e-6), (loss2, ref2)

    print("KERNEL_OK")
</pallas_src>

<mosaic_0001>
module attributes {stable_mosaic.version = 11 : i64} {
  func.func @kernel(%arg0: i32, %arg1: i32, %arg2: memref<8x128xf32, #tpu.memory_space<vmem>>, %arg3: memref<8x128xf32, #tpu.memory_space<vmem>>, %arg4: memref<8x128xf32, #tpu.memory_space<vmem>>, %arg5: memref<8x128xf32, #tpu.memory_space<vmem>>, %arg6: memref<8x128xf32, #tpu.memory_space<vmem>>) attributes {dimension_semantics = [#tpu.dimension_semantics<parallel>, #tpu.dimension_semantics<arbitrary>], iteration_bounds = array<i64: 2, 1>, scalar_prefetch = 0 : i64, scratch_operands = 1 : i64, tpu.core_type = #tpu.core_type<tc>, window_params = [{transform_indices = @transform_0, window_bounds = array<i64: 8, 128>}, {transform_indices = @transform_1, window_bounds = array<i64: 8, 128>}, {transform_indices = @transform_2, window_bounds = array<i64: 8, 128>}, {transform_indices = @transform_3, window_bounds = array<i64: 8, 128>}]} {
    %c0_i32 = arith.constant 0 : i32
    %0 = arith.cmpi eq, %arg1, %c0_i32 : i32
    %1 = arith.extui %0 : i1 to i32
    %c0_i32_0 = arith.constant 0 : i32
    %2 = arith.cmpi ne, %1, %c0_i32_0 : i32
    scf.if %2 {
      %cst_12 = arith.constant 0.000000e+00 : f32
      %19 = vector.broadcast %cst_12 : f32 to vector<8x128xf32>
      %c0_13 = arith.constant 0 : index
      %c0_14 = arith.constant 0 : index
      %20 = vector.load %arg6[%c0_13, %c0_14] : memref<8x128xf32, #tpu.memory_space<vmem>>, vector<8x128xf32>
      tpu.vector_store %arg6[%c0_13, %c0_14], %19 {strides = array<i32>} : memref<8x128xf32, #tpu.memory_space<vmem>>, vector<8x128xf32>,
    } else {
    }
    %c0 = arith.constant 0 : index
    %c0_1 = arith.constant 0 : index
    %3 = vector.load %arg4[%c0, %c0_1] : memref<8x128xf32, #tpu.memory_space<vmem>>, vector<8x128xf32>
    %cst = arith.constant 0.000000e+00 : f32
    %4 = vector.broadcast %cst : f32 to vector<8x128xf32>
    %c0_2 = arith.constant 0 : index
    %c0_3 = arith.constant 0 : index
    %5 = vector.load %arg2[%c0_2, %c0_3] : memref<8x128xf32, #tpu.memory_space<vmem>>, vector<8x128xf32>
    %6 = arith.subf %5, %3 : vector<8x128xf32>
    %7 = arith.mulf %6, %6 : vector<8x128xf32>
    %8 = arith.addf %4, %7 : vector<8x128xf32>
    %c0_4 = arith.constant 0 : index
    %c0_5 = arith.constant 0 : index
    %9 = vector.load %arg3[%c0_4, %c0_5] : memref<8x128xf32, #tpu.memory_space<vmem>>, vector<8x128xf32>
    %10 = arith.subf %9, %3 : vector<8x128xf32>
    %11 = arith.mulf %10, %10 : vector<8x128xf32>
    %12 = arith.addf %8, %11 : vector<8x128xf32>
    %c0_6 = arith.constant 0 : index
    %c0_7 = arith.constant 0 : index
    %13 = vector.load %arg6[%c0_6, %c0_7] : memref<8x128xf32, #tpu.memory_space<vmem>>, vector<8x128xf32>
    %14 = arith.addf %13, %12 : vector<8x128xf32>
    %c0_8 = arith.constant 0 : index
    %c0_9 = arith.constant 0 : index
    %15 = vector.load %arg6[%c0_8, %c0_9] : memref<8x128xf32, #tpu.memory_space<vmem>>, vector<8x128xf32>
    tpu.vector_store %arg6[%c0_8, %c0_9], %14 {strides = array<i32>} : memref<8x128xf32, #tpu.memory_space<vmem>>, vector<8x128xf32>,
    %c0_i32_10 = arith.constant 0 : i32
    %16 = arith.cmpi eq, %arg1, %c0_i32_10 : i32
    %17 = arith.extui %16 : i1 to i32
    %c0_i32_11 = arith.constant 0 : i32
    %18 = arith.cmpi ne, %17, %c0_i32_11 : i32
    scf.if %18 {
      %c0_12 = arith.constant 0 : index
      %c0_13 = arith.constant 0 : index
      %19 = vector.load %arg6[%c0_12, %c0_13] : memref<8x128xf32, #tpu.memory_space<vmem>>, vector<8x128xf32>
      %c0_14 = arith.constant 0 : index
      %c0_15 = arith.constant 0 : index
      %20 = vector.load %arg5[%c0_14, %c0_15] : memref<8x128xf32, #tpu.memory_space<vmem>>, vector<8x128xf32>
      tpu.vector_store %arg5[%c0_14, %c0_15], %19 {strides = array<i32>} : memref<8x128xf32, #tpu.memory_space<vmem>>, vector<8x128xf32>,
    } else {
    }
    return
  }
  func.func @transform_0(%arg0: i32, %arg1: i32) -> (i32, i32) {
    %c1_i32 = arith.constant 1 : i32
    %0 = arith.muli %arg0, %c1_i32 : i32
    %1 = arith.addi %0, %arg1 : i32
    %c0_i32 = arith.constant 0 : i32
    %c0_i32_0 = arith.constant 0 : i32
    return %1, %c0_i32 : i32, i32
  }
  func.func @transform_1(%arg0: i32, %arg1: i32) -> (i32, i32) {
    %c1_i32 = arith.constant 1 : i32
    %0 = arith.muli %arg0, %c1_i32 : i32
    %1 = arith.addi %0, %arg1 : i32
    %c0_i32 = arith.constant 0 : i32
    %c0_i32_0 = arith.constant 0 : i32
    return %1, %c0_i32 : i32, i32
  }
  func.func @transform_2(%arg0: i32, %arg1: i32) -> (i32, i32) {
    %c1_i32 = arith.constant 1 : i32
    %0 = arith.muli %arg0, %c1_i32 : i32
    %1 = arith.addi %0, %arg1 : i32
    %c0_i32 = arith.constant 0 : i32
    %c0_i32_0 = arith.constant 0 : i32
    return %1, %c0_i32 : i32, i32
  }
  func.func @transform_3(%arg0: i32, %arg1: i32) -> (i32, i32) {
    %c0_i32 = arith.constant 0 : i32
    %c0_i32_0 = arith.constant 0 : i32
    return %arg0, %c0_i32 : i32, i32
  }
}

</mosaic_0001>

<bundles_post_ra>
// kernel: tpu_custom_call.1
= control target key start
LH: loop header
LB: loop body
LE: loop exit
PB: predicated region body
PF: predicated region fallthrough
CT: control target
= control target key end

     0   :  { %s918_s0 = inlined_call_operand.hbm [shape: f32[16,128], index: 0, kind: input, shape index: {}]   ;;  %s919_s1 = inlined_call_operand.hbm [shape: f32[16,128], index: 1, kind: input, shape index: {}]   ;;  %s920_s2 = inlined_call_operand.hbm [shape: f32[16,128], index: 2, kind: input, shape index: {}]   ;;  %s921_s3 = inlined_call_operand.hbm [shape: f32[16,128], index: 3, kind: output, shape index: {}]  }
   0x1   :  { %925 = sst [smem:[#allocation15_spill]] %s919_s1 }
   0x2   :  { %8 = vsyncpa [#allocation4], 0 }
   0x3   :  { %10 = vsyncpa [#allocation4 + $0x1], 0 }
   0x4   :  { %11 = vsyncpa [#allocation7], 0 }
   0x5   :  { %13 = vsyncpa [#allocation7 + $0x1], 0 }
   0x6   :  { %14 = vsyncpa [#allocation5], 0 }
   0x7   :  { %16 = vsyncpa [#allocation5 + $0x1], 0  ;;  %s726_s12 = smov 0   ;;  %s728_s13 = smov 0  }
   0x8   :  { %s730_s14 = smov 0   ;;  %s732_s15 = smov 0  }
   0x9   :  { %s734_s16 = smov 0   ;;  %s736_s17 = smov 0  }
   0xa LB: > { %926 = sst [smem:[#allocation13_spill]] %s696_s16  ;;  %s757_s18 = sadd.s32 4294967295, %s700_s17   ;;  %s700_s17 = sphi %s736_s17, %s22_s17   ;;  %s696_s16 = sphi %s734_s16, %s938_s16   ;;  %s692_s15 = sphi %s732_s15, %s937_s15   ;;  %s688_s14 = sphi %s730_s14, %s941_s14   ;;  %s684_s13 = sphi %s728_s13, %s940_s13   ;;  %s680_s12 = sphi %s726_s12, %s939_s12  }
   0xb   : > { %s442_s19 = sadd.s32 4294967294, %s700_s17   ;;  %s34_s20 = sadd.s32 1, %s696_s16 }
   0xc   : > { %s43_s21 = sadd.s32 1, %s688_s14  ;;  %p36_p0 = scmp.ge.s32.totalorder %s34_s20, 2 }
   0xd   : > { %p50_p1 = scmp.ne.s32.totalorder %s688_s14, %s684_s13  ;;  %p51_p2 = scmp.eq.s32.totalorder %s700_s17, 0 }
   0xe   : > { %p56_p3 = scmp.ne.s32.totalorder %s684_s13, %s680_s12  ;;  %s943_s20 = smov (%p36_p0, %s34_s20), 0 }
   0xf   : > { %927 = sst [smem:[#allocation14_spill]] %s943_s20  ;;  %p769_p4 = por %p51_p2, %p50_p1 }
  0x10   : > { %p57_p5 = scmp.eq.s32.totalorder %s757_s18, 0  ;;  %s40_s23 = ssub.s32 %s696_s16, %s943_s20 }
  0x11   : > { %p136_p6 = scmp.eq.s32.totalorder %s757_s18, 1  ;;  %p41_p7 = scmp.eq.s32.totalorder %s40_s23, 0 }
  0x12   : > { %p777_p8 = por %p57_p5, %p56_p3  ;;  %p142_p10 = scmp.eq.s32.totalorder %s442_s19, 1 }
  0x13   : > { %p781_p9 = por %p136_p6, %p50_p1  ;;  %p482_p13 = scmp.lt.s32.totalorder %s700_s17, 2 }
  0x14   : > { %s786_s26 = scalar_select %p41_p7, %s688_s14, %s43_s21  }
  0x15   : > { %p788_p11 = por %p142_p10, %p56_p3  ;;  %s922_s28 = sand.u32 1, %s688_s14  }
  0x16   : > { %s797_s29 = sshll.u32 %s922_s28, 3  ;;  %s800_s30 = sshll.u32 %s696_s16, 7 }
  0x17   : > { %p804_p0 = pnand %p482_p13, %p769_p4  ;;  %s181_s5 = sand.u32 1, %s700_s17  }
  0x18   : > { %s933_s1 = sld [smem:[#allocation15_spill]]  ;;  %s185_s9 = scalar_lea.vmem [#allocation6], %s797_s29 }
  0x19   : > { %s193_s10 = sshll.u32 %s185_s9, 4  ;;  %p451_p1 = scmp.ge.s32.totalorder %s700_s17, 1  ;;  %s194_s10 = int_to_ptr.vmem [resolvable:$true] %s193_s10 }
  0x1a   : > { %p217_p2 = scmp.lt.s32.totalorder %s700_s17, 3  ;;  %s816_s11 = scalar_lea.sflag [#allocation7], %s181_s5 }
  0x1b   : > { %p534_p3 = pneg %p804_p0  ;;  %s545_s19 = scalar_lea.vmem %s194_s10, 128 }
  0x1c   : > { %p546_p4 = scmp.ne.s32.totalorder %s194_s10, %s545_s19  ;;  %s702_s21 = smov [#allocation6]  }
  0x1d   : > { %s550_s22 = sshll.u32 %s702_s21, 4  ;;  %s551_s22 = int_to_ptr.vmem [resolvable:$false] %s550_s22 }
  0x1e   : > { %s191_s8 = scalar_lea.hbm %s933_s1, %s800_s30  ;;  %p548_p5 = pnand %p546_p4, %p534_p3 }
  0x1f   : > { %s552_s23 = scalar_lea.vmem %s551_s22, 256  ;;  %p553_p7 = scmp.lt.s32.totalorder %s194_s10, %s551_s22 }
  0x20   : > { %p549_p6 = pneg %p548_p5  ;;  %p554_p10 = scmp.lt.s32.totalorder %s552_s23, %s545_s19 }
  0x22   : > { %p555_p13 = por %p554_p10, %p553_p7 }
  0x24   : > { %p556_p12 = pnand %p555_p13, %p549_p6 }
  0x26   : > { %559 = shalt.err (!%p556_p12)
}
  0x27   : > { %474 = dma.hbm_to_vmem [thread:$0]  (!%p804_p0), %s191_s8, 128, %s194_s10, %s816_s11  }
  0x28   : > { %p830_p4 = pnand %p451_p1, %p217_p2  ;;  %s172_s9 = scalar_lea.hbm %s918_s0, %s800_s30 }
  0x29   : > { %s166_s19 = scalar_lea.vmem [#allocation3], %s797_s29  ;;  %s210_s28 = scalar_lea.hbm %s920_s2, %s800_s30 }
  0x2a   : > { %s174_s21 = sshll.u32 %s166_s19, 4  ;;  %s935_s1 = sand.u32 1, %s688_s14   ;;  %s175_s21 = int_to_ptr.vmem [resolvable:$true] %s174_s21 }
  0x2b   : > { %s163_s20 = scalar_lea.sflag [#allocation4], %s935_s1  ;;  %s573_s8 = scalar_lea.vmem %s175_s21, 128 }
  0x2c   : > { %p574_p12 = scmp.ne.s32.totalorder %s175_s21, %s573_s8  ;;  %s703_s10 = smov [#allocation3]  }
  0x2d   : > { %s578_s16 = sshll.u32 %s703_s10, 4  ;;  %s579_s16 = int_to_ptr.vmem [resolvable:$false] %s578_s16 }
  0x2e   : > { %p576_p1 = pnand %p574_p12, %p534_p3  ;;  %s580_s6 = scalar_lea.vmem %s579_s16, 256 }
  0x2f   : > { %p581_p5 = scmp.lt.s32.totalorder %s175_s21, %s579_s16  ;;  %p582_p6 = scmp.lt.s32.totalorder %s580_s6, %s573_s8 }
  0x30   : > { %p577_p2 = pneg %p576_p1 }
  0x31   : > { %p583_p7 = por %p582_p6, %p581_p5 }
  0x33   : > { %p584_p10 = pnand %p583_p7, %p577_p2 }
  0x35   : > { %587 = shalt.err (!%p584_p10)
}
  0x36   : > { %471 = dma.hbm_to_vmem [thread:$0]  (!%p804_p0), %s172_s9, 128, %s175_s21, %s163_s20  }
  0x37   : > { %s204_s1 = scalar_lea.vmem [#allocation8], %s797_s29  ;;  %s704_s22 = smov [#allocation8]  }
  0x38   : > { %s212_s7 = sshll.u32 %s204_s1, 4  ;;  %s606_s16 = sshll.u32 %s704_s22, 4  ;;  %s213_s7 = int_to_ptr.vmem [resolvable:$true] %s212_s7  ;;  %s607_s16 = int_to_ptr.vmem [resolvable:$false] %s606_s16 }
  0x39   : > { %s601_s19 = scalar_lea.vmem %s213_s7, 128  ;;  %s608_s23 = scalar_lea.vmem %s607_s16, 256 }
  0x3a   : > { %p602_p13 = scmp.ne.s32.totalorder %s213_s7, %s601_s19  ;;  %p609_p2 = scmp.lt.s32.totalorder %s213_s7, %s607_s16 }
  0x3b   : > { %p610_p5 = scmp.lt.s32.totalorder %s608_s23, %s601_s19 }
  0x3c   : > { %p604_p12 = pnand %p602_p13, %p534_p3 }
  0x3d   : > { %p611_p6 = por %p610_p5, %p609_p2 }
  0x3e   : > { %p605_p1 = pneg %p604_p12 }
  0x40   : > { %p612_p7 = pnand %p611_p6, %p605_p1 }
  0x42   : > { %615 = shalt.err (!%p612_p7)
}
  0x43   : > { %477 = dma.hbm_to_vmem [thread:$0]  (!%p804_p0), %s210_s28, 128, %s213_s7, %s816_s11  }
  0x44   : > { %221 = sbr.rel (%p830_p4) target bundleno = 101 (0x65), region = 32  ;;  %s865_s9 = sand.u32 (!%p830_p4), 1, %s684_s13  }
  0x45   : > { %s452_s21 = sshll.u32 (!%p830_p4), %s865_s9, 3  ;;  %s224_s8 = scalar_lea.sflag (!%p830_p4), [#allocation4], %s865_s9 }
  0x46   : > { %s227_s10 = scalar_lea.vmem (!%p830_p4), [#allocation3], %s452_s21 }
  0x49   : > { %667 = dma.done.wait (%p777_p8), %s224_s8, 128  }
  0x4a   : > { %669 = vsyncadd (%p777_p8), %s224_s8, 4294967168  ;;  %s232_s28 = sand.u32 1, %s757_s18   ;;  %s236_s4 = scalar_lea.vmem [#allocation6], %s452_s21 }
  0x4b   : > { %s233_s30 = scalar_lea.sflag [#allocation7], %s232_s28 }
  0x4c   : > { %671 = dma.done.wait (%p777_p8), %s233_s30, 256  }
  0x4d   : > { %673 = vsyncadd (%p777_p8), %s233_s30, 4294967040  ;;  %s245_s11 = scalar_lea.vmem [#allocation8], %s452_s21  ;;  %v287_v1 = vld [vmem:[%s227_s10] sm:$0xff]  ;;  %v291_v2 = vld [vmem:[%s236_s4] sm:$0xff]  ;;  %s277_s5 = scalar_lea.vmem [#allocation9], %s452_s21 }
  0x4e   : > { %v286_v0 = vld [vmem:[%s245_s11] sm:$0xff]  ;;  %s317_s6 = sshll.u32 %s277_s5, 4  ;;  %s457_s1 = sshll.u32 %s692_s15, 7  ;;  %s318_s6 = int_to_ptr.vmem [resolvable:$true] %s317_s6 }
  0x4f   : > { %v288_v3 = vsub.f32 %v287_v1, %v286_v0  ;;  %v292_v4 = vsub.f32 %v291_v2, %v286_v0  ;;  %s315_s24 = scalar_lea.hbm %s921_s3, %s457_s1  ;;  %s304_s19 = scalar_lea.sflag [#allocation5], %s865_s9 }
  0x50   : > { %s616_s22 = scalar_lea.vmem %s318_s6, 128  ;;  %s705_s16 = smov [#allocation9]  }
  0x51   : > { %v289_v5 = vmul.f32 %v288_v3, %v288_v3  ;;  %v293_v6 = vmul.f32 %v292_v4, %v292_v4  ;;  %p617_p8 = scmp.ne.s32.totalorder %s318_s6, %s616_s22  ;;  %s620_s23 = sshll.u32 %s705_s16, 4  ;;  %s621_s23 = int_to_ptr.vmem [resolvable:$false] %s620_s23 }
  0x52   : > { %s622_s20 = scalar_lea.vmem %s621_s23, 256  ;;  %p623_p4 = scmp.lt.s32.totalorder %s318_s6, %s621_s23 }
  0x53   : > { %v294_v7 = vadd.f32 %v293_v6, %v289_v5  ;;  %p618_p0 = pnand %p617_p8, %p781_p9  ;;  %p624_p10 = scmp.lt.s32.totalorder %s622_s20, %s616_s22 }
  0x55   : > { %302 = vst [vmem:[%s277_s5] sm:$0xff] %v294_v7  ;;  %p619_p3 = pneg %p618_p0  ;;  %p625_p13 = por %p624_p10, %p623_p4 }
  0x57   : > { %p626_p12 = pnand %p625_p13, %p619_p3 }
  0x59   : > { %629 = shalt.err (!%p626_p12)
}
  0x5a   : > { %s630_s15 = scalar_lea.hbm %s315_s24, 128  ;;  %s634_s21 = scalar_lea.hbm %s921_s3, 256 }
  0x5b   : > { %p631_p1 = scmp.ne.s32.totalorder %s315_s24, %s630_s15  ;;  %p635_p6 = scmp.lt.s32.totalorder %s315_s24, %s921_s3 }
  0x5c   : > { %p636_p7 = scmp.lt.s32.totalorder %s634_s21, %s630_s15 }
  0x5d   : > { %p632_p2 = pnand %p631_p1, %p781_p9 }
  0x5e   : > { %p637_p8 = por %p636_p7, %p635_p6 }
  0x5f   : > { %p633_p5 = pneg %p632_p2 }
  0x61   : > { %p638_p0 = pnand %p637_p8, %p633_p5 }
  0x63   : > { %641 = shalt.err (!%p638_p0)
}
  0x64   : > { %466 = dma.vmem_to_hbm [thread:$0]  (%p781_p9), %s318_s6, 128, %s315_s24, %s304_s19  }
  0x65 PF: > { %s329_s28 = sand.u32 1, %s680_s12   ;;  %p936_p3 = scmp.ge.s32.totalorder %s700_s17, 2 }
  0x66   : > { %s330_s30 = scalar_lea.sflag [#allocation5], %s329_s28 }
  0x67   : > { %p479_p4 = pnand %p936_p3, %p788_p11 }
  0x69   : > { %p480_p10 = pneg %p479_p4 }
  0x6b   : > { %675 = dma.done.wait (%p480_p10), %s330_s30, 128  }
  0x6c   : > { %677 = vsyncadd (%p480_p10), %s330_s30, 4294967168  ;;  %s22_s17 = sadd.s32 1, %s700_s17   ;;  %s937_s15 = sld [smem:[#allocation13_spill]] }
  0x6d   : > { %p19_p13 = scmp.ge.s32.totalorder %s22_s17, 4   ;;  %s938_s16 = sld [smem:[#allocation14_spill]] }
  0x6e   : > { %s939_s12 = smov %s684_s13  ;;  %s940_s13 = smov %s688_s14 }
  0x6f   : > { %s941_s14 = smov %s786_s26  ;;  %21 = sbr.rel (!%p19_p13) target bundleno = 10 (0xa), region = 109 }
  0x74   :  { %335 = vsyncpa [#allocation4], 1 }
  0x75   :  { %337 = vsyncpa [#allocation4 + $0x1], 1 }
  0x76   :  { %338 = vsyncpa [#allocation7], 1 }
  0x77   :  { %340 = vsyncpa [#allocation7 + $0x1], 1 }
  0x78   :  { %341 = vsyncpa [#allocation5], 1 }
  0x79   :  { %343 = vsyncpa [#allocation5 + $0x1], 1 }

</bundles_post_ra>
